<compile_context>
chip_gen: v7x
topology: tpu7x:2x2x1
jax: 0.10.0
libtpu: 0.0.40
codegen_flags: <defaults>
</compile_context>

<pallas_src>
import functools

import numpy as np
import jax
import jax.numpy as jnp
from jax.experimental import pallas as pl
from jax.experimental.pallas import tpu as pltpu  # noqa: F401  (TPU backend)


# ----------------------------------------------------------------------------
# Single fused kernel: encoders + token assembly + transformer block
# ----------------------------------------------------------------------------
def _network_kernel(xcol_ref, wconv_ref, pool_ref, wfc_ref, bfc_ref,
                    cls_ref, sel_ref, mask_ref,
                    ln1g_ref, ln1b_ref,
                    wq_ref, bq_ref, wkv_ref, bkv_ref, wo_ref, bo_ref,
                    ln2g_ref, ln2b_ref, w1_ref, b1_ref, w2_ref, b2_ref,
                    o_ref, *, d):
    f32 = jnp.float32

    # ---- encoders: fused block-diagonal conv GEMM (bias via ones row) -------
    feat = jnp.maximum(
        jnp.dot(wconv_ref[...], xcol_ref[...], preferred_element_type=f32),
        0.0)                                                      # (16, B*HW)

    # Global average pool as one matmul against a constant pooling matrix
    # (1/HW folded into the matrix).
    pooled = jnp.dot(feat, pool_ref[...], preferred_element_type=f32)   # (16, B)

    # Fused FC for both encoders, contracting on axis 0 (no explicit transpose).
    emb = jax.lax.dot_general(pooled, wfc_ref[...], (((0,), (0,)), ((), ())),
                              preferred_element_type=f32) + bfc_ref[...]  # (B, 2D)

    # ---- token assembly: one concat of 3 tiles + constant selection matmul --
    cls_row = cls_ref[...]                                        # (1, D)
    stacked = jnp.concatenate([cls_row, emb[:, :d], emb[:, d:]], axis=0)  # (1+2B, D)
    x = jnp.dot(sel_ref[...], stacked, preferred_element_type=f32)        # (bt, D)
    bt = x.shape[0]
    nc = o_ref.shape[0]                                           # B * repeat

    def layer_norm(v, g, beta):
        mu = jnp.mean(v, axis=-1, keepdims=True)
        var = jnp.mean((v - mu) ** 2, axis=-1, keepdims=True)
        return (v - mu) * jax.lax.rsqrt(var + 1e-5) * g + beta

    ln1g = ln1g_ref[...]
    ln1b = ln1b_ref[...]

    # ---- pre-LN single-head attention ---------------------------------------
    # K/V for every token; Q only for the (identical) CLS rows: one shared
    # (1, D) query with 1/sqrt(D) already folded into Wq/bq.
    h = layer_norm(x, ln1g, ln1b)                                 # (bt, D)
    kv = jnp.dot(h, wkv_ref[...], preferred_element_type=f32) + bkv_ref[...]
    k = kv[:, :d]
    v = kv[:, d:]

    q_cls = jnp.dot(layer_norm(cls_row, ln1g, ln1b), wq_ref[...],
                    preferred_element_type=f32) + bq_ref[...]     # (1, D)
    scores = jax.lax.dot_general(q_cls, k, (((1,), (1,)), ((), ())),
                                 preferred_element_type=f32)      # (1, bt)
    scores_b = jnp.broadcast_to(scores, (nc, bt))

    # Constant block-diagonal mask: CLS of sample i attends only to its 3 tokens.
    s = jnp.where(mask_ref[...] > 0.0, scores_b, -jnp.inf)
    s = s - jnp.max(s, axis=-1, keepdims=True)
    e = jnp.exp(s)
    p = e * pl.reciprocal(jnp.sum(e, axis=-1, keepdims=True), approx=True)
    ctx = jnp.dot(p, v, preferred_element_type=f32)               # (nc, D)

    # Residual (CLS rows of x are exactly the cls token), then MLP — all of it
    # only on the nc CLS rows; no final CLS gather needed.
    xc = cls_row + jnp.dot(ctx, wo_ref[...], preferred_element_type=f32) + bo_ref[...]

    h2 = layer_norm(xc, ln2g_ref[...], ln2b_ref[...])
    m = jnp.dot(h2, w1_ref[...], preferred_element_type=f32) + b1_ref[...]
    # TODO(synk): PyTorch nn.GELU defaults to exact erf; tanh approximation used here.
    m = jax.nn.gelu(m, approximate=True)
    m = jnp.dot(m, w2_ref[...], preferred_element_type=f32) + b2_ref[...]

    o_ref[...] = (xc + m).astype(o_ref.dtype)


# ----------------------------------------------------------------------------
# Wrapper-side im2col for 3x3 / stride 1 / pad 1 convolution (NCHW)
# ----------------------------------------------------------------------------
def _im2col_t(x):
    """(B, C, H, W) -> (C*9, B*H*W) patch matrix (lane-dense GEMM operand)."""
    B, C, H, W = x.shape
    xp = jnp.pad(x, ((0, 0), (0, 0), (1, 1), (1, 1)))
    patches = [xp[:, :, i:i + H, j:j + W] for i in range(3) for j in range(3)]
    p = jnp.stack(patches, axis=2)            # (B, C, 9, H, W)
    p = p.transpose(1, 2, 0, 3, 4)            # (C, 9, B, H, W)
    return p.reshape(C * 9, B * H * W)


# ----------------------------------------------------------------------------
# Compile-time constant matrices (numpy -> baked constants under jit)
# ----------------------------------------------------------------------------
def _pool_matrix(batch, hw):
    return np.repeat(np.eye(batch, dtype=np.float32), hw, axis=0) / float(hw)


def _selection_matrix(batch, repeat):
    """(bt, 1+2B) selection/repeat matrix: rows 3i,3i+1,3i+2 = cls, vid[b], aud[b]."""
    nc = batch * repeat
    sel = np.zeros((nc * 3, 1 + 2 * batch), np.float32)
    for i in range(nc):
        b = i // repeat
        sel[3 * i, 0] = 1.0
        sel[3 * i + 1, 1 + b] = 1.0
        sel[3 * i + 2, 1 + batch + b] = 1.0
    return sel


def _attn_mask(nc, t):
    mask = np.zeros((nc, nc * t), np.float32)
    for i in range(nc):
        mask[i, t * i:t * (i + 1)] = 1.0
    return mask


# ----------------------------------------------------------------------------
# network.forward equivalent (phase/train/num_sample are static Python values)
# ----------------------------------------------------------------------------
def network_forward(video, audio, params, phase=0, train=True, num_sample=2):
    B, _, H, W = video.shape
    D = params['wq'].shape[0]
    T = 3
    repeat = num_sample if (train and phase == 1) else 1
    hw = H * W
    f32 = jnp.float32

    # --- fused conv GEMM operands (bias folded in via a ones row) ------------
    xcol_v = _im2col_t(video)                            # (Cin_v*9, B*HW)
    xcol_a = _im2col_t(audio)                            # (Cin_a*9, B*HW)
    ones_row = jnp.ones((1, B * hw), f32)
    xcol = jnp.concatenate([xcol_v, xcol_a, ones_row], axis=0)        # (37, B*HW)

    cout_v = params['vis_conv_w'].shape[0]
    cout_a = params['aud_conv_w'].shape[0]
    wcv = params['vis_conv_w'].reshape(cout_v, -1)       # (8, 27)
    wca = params['aud_conv_w'].reshape(cout_a, -1)       # (8, 9)
    kv_dim, ka_dim = wcv.shape[1], wca.shape[1]
    wconv = jnp.concatenate([
        jnp.concatenate([wcv, jnp.zeros((cout_v, ka_dim), f32),
                         params['vis_conv_b'].reshape(cout_v, 1)], axis=1),
        jnp.concatenate([jnp.zeros((cout_a, kv_dim), f32), wca,
                         params['aud_conv_b'].reshape(cout_a, 1)], axis=1),
    ], axis=0)                                           # (16, 37)

    # --- fused block-diagonal FC ---------------------------------------------
    wfc = jnp.concatenate([
        jnp.concatenate([params['vis_fc_w'], jnp.zeros((cout_v, D), f32)], axis=1),
        jnp.concatenate([jnp.zeros((cout_a, D), f32), params['aud_fc_w']], axis=1),
    ], axis=0)                                           # (16, 2D)
    bfc = jnp.concatenate([params['vis_fc_b'], params['aud_fc_b']]).reshape(1, 2 * D)

    # --- fused K/V projection; 1/sqrt(D) folded into Wq/bq -------------------
    scale = 1.0 / float(D) ** 0.5
    wq = params['wq'] * scale
    bq = (params['bq'] * scale).reshape(1, D)
    wkv = jnp.concatenate([params['wk'], params['wv']], axis=1)           # (D, 2D)
    bkv = jnp.concatenate([params['bk'], params['bv']]).reshape(1, 2 * D)

    # --- compile-time constants ----------------------------------------------
    pool = jnp.asarray(_pool_matrix(B, hw))              # (B*HW, B)
    sel = jnp.asarray(_selection_matrix(B, repeat))      # (bt, 1+2B)
    mask = jnp.asarray(_attn_mask(B * repeat, T))        # (B*repeat, bt)

    kernel = functools.partial(_network_kernel, d=D)
    return pl.pallas_call(
        kernel,
        out_shape=jax.ShapeDtypeStruct((B * repeat, D), jnp.float32),
    )(xcol, wconv, pool, wfc, bfc,
      params['cls'].reshape(1, D), sel, mask,
      params['ln1_g'].reshape(1, D), params['ln1_b'].reshape(1, D),
      wq, bq, wkv, bkv,
      params['wo'], params['bo'].reshape(1, D),
      params['ln2_g'].reshape(1, D), params['ln2_b'].reshape(1, D),
      params['w1'], params['b1'].reshape(1, -1),
      params['w2'], params['b2'].reshape(1, D))


# ----------------------------------------------------------------------------
# Deterministic parameter initialization
# ----------------------------------------------------------------------------
def init_params(key, cin_vis=3, cin_aud=1, cconv=8, d=32):
    keys = jax.random.split(key, 12)
    n = lambda k, shape, s=0.05: (s * jax.random.normal(k, shape)).astype(jnp.float32)
    hidden = 4 * d
    return {
        'vis_conv_w': n(keys[0], (cconv, cin_vis, 3, 3)),
        'vis_conv_b': jnp.zeros((cconv,), jnp.float32),
        'vis_fc_w': n(keys[1], (cconv, d)),
        'vis_fc_b': jnp.zeros((d,), jnp.float32),
        'aud_conv_w': n(keys[2], (cconv, cin_aud, 3, 3)),
        'aud_conv_b': jnp.zeros((cconv,), jnp.float32),
        'aud_fc_w': n(keys[3], (cconv, d)),
        'aud_fc_b': jnp.zeros((d,), jnp.float32),
        'cls': n(keys[4], (1, 1, d)),
        'ln1_g': jnp.ones((d,), jnp.float32),
        'ln1_b': jnp.zeros((d,), jnp.float32),
        'wq': n(keys[5], (d, d)), 'bq': jnp.zeros((d,), jnp.float32),
        'wk': n(keys[6], (d, d)), 'bk': jnp.zeros((d,), jnp.float32),
        'wv': n(keys[7], (d, d)), 'bv': jnp.zeros((d,), jnp.float32),
        'wo': n(keys[8], (d, d)), 'bo': jnp.zeros((d,), jnp.float32),
        'ln2_g': jnp.ones((d,), jnp.float32),
        'ln2_b': jnp.zeros((d,), jnp.float32),
        'w1': n(keys[9], (d, hidden)), 'b1': jnp.zeros((hidden,), jnp.float32),
        'w2': n(keys[10], (hidden, d)), 'b2': jnp.zeros((d,), jnp.float32),
    }


if __name__ == "__main__":
    key = jax.random.PRNGKey(0)
    kv, ka, kp = jax.random.split(key, 3)

    B, H, W = 2, 16, 16
    video = jax.random.normal(kv, (B, 3, H, W), dtype=jnp.float32)   # NCHW
    audio = jax.random.normal(ka, (B, 1, H, W), dtype=jnp.float32)   # NCHW spectrogram
    params = init_params(kp)

    # phase 0 (standard training / eval path)
    fwd = jax.jit(functools.partial(network_forward, phase=0, train=True))
    cls_emb = fwd(video, audio, params)
    jax.block_until_ready(cls_emb)
    assert cls_emb.shape == (B, 32)
    assert bool(jnp.all(jnp.isfinite(cls_emb)))

    # phase 1 (repeat_interleave of embeddings before the transformer)
    fwd_p1 = jax.jit(functools.partial(network_forward, phase=1, train=True, num_sample=2))
    cls_emb_p1 = fwd_p1(video, audio, params)
    jax.block_until_ready(cls_emb_p1)
    assert cls_emb_p1.shape == (B * 2, 32)
    assert bool(jnp.all(jnp.isfinite(cls_emb_p1)))

    print("KERNEL_OK")
</pallas_src>

<mosaic_0001>
module attributes {stable_mosaic.version = 11 : i64} {
  func.func @_network_kernel(%arg0: memref<37x512xf32, #tpu.memory_space<vmem>>, %arg1: memref<16x37xf32, #tpu.memory_space<vmem>>, %arg2: memref<512x2xf32, #tpu.memory_space<vmem>>, %arg3: memref<16x64xf32, #tpu.memory_space<vmem>>, %arg4: memref<1x64xf32, #tpu.memory_space<vmem>>, %arg5: memref<1x32xf32, #tpu.memory_space<vmem>>, %arg6: memref<6x5xf32, #tpu.memory_space<vmem>>, %arg7: memref<2x6xf32, #tpu.memory_space<vmem>>, %arg8: memref<1x32xf32, #tpu.memory_space<vmem>>, %arg9: memref<1x32xf32, #tpu.memory_space<vmem>>, %arg10: memref<32x32xf32, #tpu.memory_space<vmem>>, %arg11: memref<1x32xf32, #tpu.memory_space<vmem>>, %arg12: memref<32x64xf32, #tpu.memory_space<vmem>>, %arg13: memref<1x64xf32, #tpu.memory_space<vmem>>, %arg14: memref<32x32xf32, #tpu.memory_space<vmem>>, %arg15: memref<1x32xf32, #tpu.memory_space<vmem>>, %arg16: memref<1x32xf32, #tpu.memory_space<vmem>>, %arg17: memref<1x32xf32, #tpu.memory_space<vmem>>, %arg18: memref<32x128xf32, #tpu.memory_space<vmem>>, %arg19: memref<1x128xf32, #tpu.memory_space<vmem>>, %arg20: memref<128x32xf32, #tpu.memory_space<vmem>>, %arg21: memref<1x32xf32, #tpu.memory_space<vmem>>, %arg22: memref<2x32xf32, #tpu.memory_space<vmem>>) attributes {dimension_semantics = [], scalar_prefetch = 0 : i64, scratch_operands = 0 : i64, tpu.core_type = #tpu.core_type<tc>} {
    %c0 = arith.constant 0 : index
    %c0_0 = arith.constant 0 : index
    %0 = vector.load %arg1[%c0, %c0_0] : memref<16x37xf32, #tpu.memory_space<vmem>>, vector<16x37xf32>
    %c0_1 = arith.constant 0 : index
    %c0_2 = arith.constant 0 : index
    %1 = vector.load %arg0[%c0_1, %c0_2] : memref<37x512xf32, #tpu.memory_space<vmem>>, vector<37x512xf32>
    %cst = arith.constant dense<0.000000e+00> : vector<16x512xf32>
    %2 = tpu.matmul %0, %1, %cst {dimension_numbers = #tpu.dot_dimension_numbers<[1], [0], [0], [1], [0, 0, 1, 1], [], []>} : vector<16x37xf32>, vector<37x512xf32>, vector<16x512xf32> -> vector<16x512xf32>
    %cst_3 = arith.constant 0.000000e+00 : f32
    %3 = vector.broadcast %cst_3 : f32 to vector<16x512xf32>
    %4 = arith.maximumf %2, %3 : vector<16x512xf32>
    %c0_4 = arith.constant 0 : index
    %c0_5 = arith.constant 0 : index
    %5 = vector.load %arg2[%c0_4, %c0_5] : memref<512x2xf32, #tpu.memory_space<vmem>>, vector<512x2xf32>
    %cst_6 = arith.constant dense<0.000000e+00> : vector<16x2xf32>
    %6 = tpu.matmul %4, %5, %cst_6 {dimension_numbers = #tpu.dot_dimension_numbers<[1], [0], [0], [1], [0, 0, 1, 1], [], []>} : vector<16x512xf32>, vector<512x2xf32>, vector<16x2xf32> -> vector<16x2xf32>
    %c0_7 = arith.constant 0 : index
    %c0_8 = arith.constant 0 : index
    %7 = vector.load %arg3[%c0_7, %c0_8] : memref<16x64xf32, #tpu.memory_space<vmem>>, vector<16x64xf32>
    %cst_9 = arith.constant dense<0.000000e+00> : vector<2x64xf32>
    %8 = tpu.matmul %6, %7, %cst_9 {dimension_numbers = #tpu.dot_dimension_numbers<[0], [0], [1], [1], [0, 1, 1, 1], [], []>} : vector<16x2xf32>, vector<16x64xf32>, vector<2x64xf32> -> vector<2x64xf32>
    %c0_10 = arith.constant 0 : index
    %c0_11 = arith.constant 0 : index
    %9 = vector.load %arg4[%c0_10, %c0_11] : memref<1x64xf32, #tpu.memory_space<vmem>>, vector<1x64xf32>
    %10 = vector.broadcast %9 : vector<1x64xf32> to vector<2x64xf32>
    %11 = arith.addf %8, %10 : vector<2x64xf32>
    %c0_12 = arith.constant 0 : index
    %c0_13 = arith.constant 0 : index
    %12 = vector.load %arg5[%c0_12, %c0_13] : memref<1x32xf32, #tpu.memory_space<vmem>>, vector<1x32xf32>
    %13 = vector.extract_strided_slice %11 {offsets = [0, 0], sizes = [2, 32], strides = [1, 1]} : vector<2x64xf32> to vector<2x32xf32>
    %14 = vector.extract_strided_slice %11 {offsets = [0, 32], sizes = [2, 32], strides = [1, 1]} : vector<2x64xf32> to vector<2x32xf32>
    %15 = tpu.concatenate %12, %13, %14 in 0 : vector<1x32xf32>, vector<2x32xf32>, vector<2x32xf32> -> vector<5x32xf32>
    %c0_14 = arith.constant 0 : index
    %c0_15 = arith.constant 0 : index
    %16 = vector.load %arg6[%c0_14, %c0_15] : memref<6x5xf32, #tpu.memory_space<vmem>>, vector<6x5xf32>
    %cst_16 = arith.constant dense<0.000000e+00> : vector<6x32xf32>
    %17 = tpu.matmul %16, %15, %cst_16 {dimension_numbers = #tpu.dot_dimension_numbers<[1], [0], [0], [1], [0, 0, 1, 1], [], []>} : vector<6x5xf32>, vector<5x32xf32>, vector<6x32xf32> -> vector<6x32xf32>
    %c0_17 = arith.constant 0 : index
    %c0_18 = arith.constant 0 : index
    %18 = vector.load %arg8[%c0_17, %c0_18] : memref<1x32xf32, #tpu.memory_space<vmem>>, vector<1x32xf32>
    %c0_19 = arith.constant 0 : index
    %c0_20 = arith.constant 0 : index
    %19 = vector.load %arg9[%c0_19, %c0_20] : memref<1x32xf32, #tpu.memory_space<vmem>>, vector<1x32xf32>
    %cst_21 = arith.constant dense<0.000000e+00> : vector<6xf32>
    %20 = vector.multi_reduction <add>, %17, %cst_21 [1] : vector<6x32xf32> to vector<6xf32>
    %21 = vector.shape_cast %20 : vector<6xf32> to vector<6x1xf32>
    %cst_22 = arith.constant 3.200000e+01 : f32
    %22 = vector.broadcast %cst_22 : f32 to vector<6x1xf32>
    %23 = arith.divf %21, %22 : vector<6x1xf32>
    %24 = vector.broadcast %23 : vector<6x1xf32> to vector<6x32xf32>
    %25 = arith.subf %17, %24 : vector<6x32xf32>
    %26 = arith.mulf %25, %25 : vector<6x32xf32>
    %cst_23 = arith.constant dense<0.000000e+00> : vector<6xf32>
    %27 = vector.multi_reduction <add>, %26, %cst_23 [1] : vector<6x32xf32> to vector<6xf32>
    %28 = vector.shape_cast %27 : vector<6xf32> to vector<6x1xf32>
    %cst_24 = arith.constant 3.200000e+01 : f32
    %29 = vector.broadcast %cst_24 : f32 to vector<6x1xf32>
    %30 = arith.divf %28, %29 : vector<6x1xf32>
    %31 = vector.broadcast %23 : vector<6x1xf32> to vector<6x32xf32>
    %32 = arith.subf %17, %31 : vector<6x32xf32>
    %cst_25 = arith.constant 9.99999974E-6 : f32
    %33 = vector.broadcast %cst_25 : f32 to vector<6x1xf32>
    %34 = arith.addf %30, %33 : vector<6x1xf32>
    %35 = math.rsqrt %34 : vector<6x1xf32>
    %36 = vector.broadcast %35 : vector<6x1xf32> to vector<6x32xf32>
    %37 = arith.mulf %32, %36 : vector<6x32xf32>
    %38 = vector.broadcast %18 : vector<1x32xf32> to vector<6x32xf32>
    %39 = arith.mulf %37, %38 : vector<6x32xf32>
    %40 = vector.broadcast %19 : vector<1x32xf32> to vector<6x32xf32>
    %41 = arith.addf %39, %40 : vector<6x32xf32>
    %c0_26 = arith.constant 0 : index
    %c0_27 = arith.constant 0 : index
    %42 = vector.load %arg12[%c0_26, %c0_27] : memref<32x64xf32, #tpu.memory_space<vmem>>, vector<32x64xf32>
    %cst_28 = arith.constant dense<0.000000e+00> : vector<6x64xf32>
    %43 = tpu.matmul %41, %42, %cst_28 {dimension_numbers = #tpu.dot_dimension_numbers<[1], [0], [0], [1], [0, 0, 1, 1], [], []>} : vector<6x32xf32>, vector<32x64xf32>, vector<6x64xf32> -> vector<6x64xf32>
    %c0_29 = arith.constant 0 : index
    %c0_30 = arith.constant 0 : index
    %44 = vector.load %arg13[%c0_29, %c0_30] : memref<1x64xf32, #tpu.memory_space<vmem>>, vector<1x64xf32>
    %45 = vector.broadcast %44 : vector<1x64xf32> to vector<6x64xf32>
    %46 = arith.addf %43, %45 : vector<6x64xf32>
    %47 = vector.extract_strided_slice %46 {offsets = [0, 0], sizes = [6, 32], strides = [1, 1]} : vector<6x64xf32> to vector<6x32xf32>
    %48 = vector.extract_strided_slice %46 {offsets = [0, 32], sizes = [6, 32], strides = [1, 1]} : vector<6x64xf32> to vector<6x32xf32>
    %cst_31 = arith.constant dense<0.000000e+00> : vector<1xf32>
    %49 = vector.multi_reduction <add>, %12, %cst_31 [1] : vector<1x32xf32> to vector<1xf32>
    %50 = vector.shape_cast %49 : vector<1xf32> to vector<1x1xf32>
    %cst_32 = arith.constant 3.200000e+01 : f32
    %51 = vector.broadcast %cst_32 : f32 to vector<1x1xf32>
    %52 = arith.divf %50, %51 : vector<1x1xf32>
    %53 = vector.broadcast %52 : vector<1x1xf32> to vector<1x32xf32>
    %54 = arith.subf %12, %53 : vector<1x32xf32>
    %55 = arith.mulf %54, %54 : vector<1x32xf32>
    %cst_33 = arith.constant dense<0.000000e+00> : vector<1xf32>
    %56 = vector.multi_reduction <add>, %55, %cst_33 [1] : vector<1x32xf32> to vector<1xf32>
    %57 = vector.shape_cast %56 : vector<1xf32> to vector<1x1xf32>
    %cst_34 = arith.constant 3.200000e+01 : f32
    %58 = vector.broadcast %cst_34 : f32 to vector<1x1xf32>
    %59 = arith.divf %57, %58 : vector<1x1xf32>
    %60 = vector.broadcast %52 : vector<1x1xf32> to vector<1x32xf32>
    %61 = arith.subf %12, %60 : vector<1x32xf32>
    %cst_35 = arith.constant 9.99999974E-6 : f32
    %62 = vector.broadcast %cst_35 : f32 to vector<1x1xf32>
    %63 = arith.addf %59, %62 : vector<1x1xf32>
    %64 = math.rsqrt %63 : vector<1x1xf32>
    %65 = vector.broadcast %64 : vector<1x1xf32> to vector<1x32xf32>
    %66 = arith.mulf %61, %65 : vector<1x32xf32>
    %67 = arith.mulf %66, %18 : vector<1x32xf32>
    %68 = arith.addf %67, %19 : vector<1x32xf32>
    %c0_36 = arith.constant 0 : index
    %c0_37 = arith.constant 0 : index
    %69 = vector.load %arg10[%c0_36, %c0_37] : memref<32x32xf32, #tpu.memory_space<vmem>>, vector<32x32xf32>
    %cst_38 = arith.constant dense<0.000000e+00> : vector<1x32xf32>
    %70 = tpu.matmul %68, %69, %cst_38 {dimension_numbers = #tpu.dot_dimension_numbers<[1], [0], [0], [1], [0, 0, 1, 1], [], []>} : vector<1x32xf32>, vector<32x32xf32>, vector<1x32xf32> -> vector<1x32xf32>
    %c0_39 = arith.constant 0 : index
    %c0_40 = arith.constant 0 : index
    %71 = vector.load %arg11[%c0_39, %c0_40] : memref<1x32xf32, #tpu.memory_space<vmem>>, vector<1x32xf32>
    %72 = arith.addf %70, %71 : vector<1x32xf32>
    %cst_41 = arith.constant dense<0.000000e+00> : vector<1x6xf32>
    %73 = tpu.matmul %72, %47, %cst_41 {dimension_numbers = #tpu.dot_dimension_numbers<[1], [1], [0], [0], [0, 0, 1, 0], [], []>} : vector<1x32xf32>, vector<6x32xf32>, vector<1x6xf32> -> vector<1x6xf32>
    %74 = vector.shape_cast %73 : vector<1x6xf32> to vector<1x6xf32>
    %75 = vector.broadcast %74 : vector<1x6xf32> to vector<2x6xf32>
    %c0_42 = arith.constant 0 : index
    %c0_43 = arith.constant 0 : index
    %76 = vector.load %arg7[%c0_42, %c0_43] : memref<2x6xf32, #tpu.memory_space<vmem>>, vector<2x6xf32>
    %cst_44 = arith.constant 0.000000e+00 : f32
    %77 = vector.broadcast %cst_44 : f32 to vector<2x6xf32>
    %78 = arith.cmpf ogt, %76, %77 : vector<2x6xf32>
    %cst_45 = arith.constant 0xFF800000 : f32
    %79 = vector.broadcast %cst_45 : f32 to vector<2x6xf32>
    %80 = arith.select %78, %75, %79 : vector<2x6xi1>, vector<2x6xf32>
    %cst_46 = arith.constant dense<0xFF800000> : vector<2xf32>
    %81 = vector.multi_reduction <maximumf>, %80, %cst_46 [1] : vector<2x6xf32> to vector<2xf32>
    %82 = vector.shape_cast %81 : vector<2xf32> to vector<2x1xf32>
    %83 = vector.broadcast %82 : vector<2x1xf32> to vector<2x6xf32>
    %84 = arith.subf %80, %83 : vector<2x6xf32>
    %85 = math.exp %84 : vector<2x6xf32>
    %cst_47 = arith.constant dense<0.000000e+00> : vector<2xf32>
    %86 = vector.multi_reduction <add>, %85, %cst_47 [1] : vector<2x6xf32> to vector<2xf32>
    %87 = vector.shape_cast %86 : vector<2xf32> to vector<2x1xf32>
    %88 = tpu.reciprocal %87 {approx = true} : vector<2x1xf32> -> vector<2x1xf32>
    %89 = vector.broadcast %88 : vector<2x1xf32> to vector<2x6xf32>
    %90 = arith.mulf %85, %89 : vector<2x6xf32>
    %cst_48 = arith.constant dense<0.000000e+00> : vector<2x32xf32>
    %91 = tpu.matmul %90, %48, %cst_48 {dimension_numbers = #tpu.dot_dimension_numbers<[1], [0], [0], [1], [0, 0, 1, 1], [], []>} : vector<2x6xf32>, vector<6x32xf32>, vector<2x32xf32> -> vector<2x32xf32>
    %c0_49 = arith.constant 0 : index
    %c0_50 = arith.constant 0 : index
    %92 = vector.load %arg14[%c0_49, %c0_50] : memref<32x32xf32, #tpu.memory_space<vmem>>, vector<32x32xf32>
    %cst_51 = arith.constant dense<0.000000e+00> : vector<2x32xf32>
    %93 = tpu.matmul %91, %92, %cst_51 {dimension_numbers = #tpu.dot_dimension_numbers<[1], [0], [0], [1], [0, 0, 1, 1], [], []>} : vector<2x32xf32>, vector<32x32xf32>, vector<2x32xf32> -> vector<2x32xf32>
    %94 = vector.broadcast %12 : vector<1x32xf32> to vector<2x32xf32>
    %95 = arith.addf %94, %93 : vector<2x32xf32>
    %c0_52 = arith.constant 0 : index
    %c0_53 = arith.constant 0 : index
    %96 = vector.load %arg15[%c0_52, %c0_53] : memref<1x32xf32, #tpu.memory_space<vmem>>, vector<1x32xf32>
    %97 = vector.broadcast %96 : vector<1x32xf32> to vector<2x32xf32>
    %98 = arith.addf %95, %97 : vector<2x32xf32>
    %c0_54 = arith.constant 0 : index
    %c0_55 = arith.constant 0 : index
    %99 = vector.load %arg16[%c0_54, %c0_55] : memref<1x32xf32, #tpu.memory_space<vmem>>, vector<1x32xf32>
    %c0_56 = arith.constant 0 : index
    %c0_57 = arith.constant 0 : index
    %100 = vector.load %arg17[%c0_56, %c0_57] : memref<1x32xf32, #tpu.memory_space<vmem>>, vector<1x32xf32>
    %cst_58 = arith.constant dense<0.000000e+00> : vector<2xf32>
    %101 = vector.multi_reduction <add>, %98, %cst_58 [1] : vector<2x32xf32> to vector<2xf32>
    %102 = vector.shape_cast %101 : vector<2xf32> to vector<2x1xf32>
    %cst_59 = arith.constant 3.200000e+01 : f32
    %103 = vector.broadcast %cst_59 : f32 to vector<2x1xf32>
    %104 = arith.divf %102, %103 : vector<2x1xf32>
    %105 = vector.broadcast %104 : vector<2x1xf32> to vector<2x32xf32>
    %106 = arith.subf %98, %105 : vector<2x32xf32>
    %107 = arith.mulf %106, %106 : vector<2x32xf32>
    %cst_60 = arith.constant dense<0.000000e+00> : vector<2xf32>
    %108 = vector.multi_reduction <add>, %107, %cst_60 [1] : vector<2x32xf32> to vector<2xf32>
    %109 = vector.shape_cast %108 : vector<2xf32> to vector<2x1xf32>
    %cst_61 = arith.constant 3.200000e+01 : f32
    %110 = vector.broadcast %cst_61 : f32 to vector<2x1xf32>
    %111 = arith.divf %109, %110 : vector<2x1xf32>
    %112 = vector.broadcast %104 : vector<2x1xf32> to vector<2x32xf32>
    %113 = arith.subf %98, %112 : vector<2x32xf32>
    %cst_62 = arith.constant 9.99999974E-6 : f32
    %114 = vector.broadcast %cst_62 : f32 to vector<2x1xf32>
    %115 = arith.addf %111, %114 : vector<2x1xf32>
    %116 = math.rsqrt %115 : vector<2x1xf32>
    %117 = vector.broadcast %116 : vector<2x1xf32> to vector<2x32xf32>
    %118 = arith.mulf %113, %117 : vector<2x32xf32>
    %119 = vector.broadcast %99 : vector<1x32xf32> to vector<2x32xf32>
    %120 = arith.mulf %118, %119 : vector<2x32xf32>
    %121 = vector.broadcast %100 : vector<1x32xf32> to vector<2x32xf32>
    %122 = arith.addf %120, %121 : vector<2x32xf32>
    %c0_63 = arith.constant 0 : index
    %c0_64 = arith.constant 0 : index
    %123 = vector.load %arg18[%c0_63, %c0_64] : memref<32x128xf32, #tpu.memory_space<vmem>>, vector<32x128xf32>
    %cst_65 = arith.constant dense<0.000000e+00> : vector<2x128xf32>
    %124 = tpu.matmul %122, %123, %cst_65 {dimension_numbers = #tpu.dot_dimension_numbers<[1], [0], [0], [1], [0, 0, 1, 1], [], []>} : vector<2x32xf32>, vector<32x128xf32>, vector<2x128xf32> -> vector<2x128xf32>
    %c0_66 = arith.constant 0 : index
    %c0_67 = arith.constant 0 : index
    %125 = vector.load %arg19[%c0_66, %c0_67] : memref<1x128xf32, #tpu.memory_space<vmem>>, vector<1x128xf32>
    %126 = vector.broadcast %125 : vector<1x128xf32> to vector<2x128xf32>
    %127 = arith.addf %124, %126 : vector<2x128xf32>
    %128 = arith.mulf %127, %127 : vector<2x128xf32>
    %129 = arith.mulf %127, %128 : vector<2x128xf32>
    %cst_68 = arith.constant 4.471500e-02 : f32
    %130 = vector.broadcast %cst_68 : f32 to vector<2x128xf32>
    %131 = arith.mulf %130, %129 : vector<2x128xf32>
    %132 = arith.addf %127, %131 : vector<2x128xf32>
    %cst_69 = arith.constant 0.797884583 : f32
    %133 = vector.broadcast %cst_69 : f32 to vector<2x128xf32>
    %134 = arith.mulf %133, %132 : vector<2x128xf32>
    %135 = math.tanh %134 : vector<2x128xf32>
    %cst_70 = arith.constant 1.000000e+00 : f32
    %136 = vector.broadcast %cst_70 : f32 to vector<2x128xf32>
    %137 = arith.addf %136, %135 : vector<2x128xf32>
    %cst_71 = arith.constant 5.000000e-01 : f32
    %138 = vector.broadcast %cst_71 : f32 to vector<2x128xf32>
    %139 = arith.mulf %138, %137 : vector<2x128xf32>
    %140 = arith.mulf %127, %139 : vector<2x128xf32>
    %c0_72 = arith.constant 0 : index
    %c0_73 = arith.constant 0 : index
    %141 = vector.load %arg20[%c0_72, %c0_73] : memref<128x32xf32, #tpu.memory_space<vmem>>, vector<128x32xf32>
    %cst_74 = arith.constant dense<0.000000e+00> : vector<2x32xf32>
    %142 = tpu.matmul %140, %141, %cst_74 {dimension_numbers = #tpu.dot_dimension_numbers<[1], [0], [0], [1], [0, 0, 1, 1], [], []>} : vector<2x128xf32>, vector<128x32xf32>, vector<2x32xf32> -> vector<2x32xf32>
    %c0_75 = arith.constant 0 : index
    %c0_76 = arith.constant 0 : index
    %143 = vector.load %arg21[%c0_75, %c0_76] : memref<1x32xf32, #tpu.memory_space<vmem>>, vector<1x32xf32>
    %144 = vector.broadcast %143 : vector<1x32xf32> to vector<2x32xf32>
    %145 = arith.addf %142, %144 : vector<2x32xf32>
    %146 = arith.addf %98, %145 : vector<2x32xf32>
    %c0_77 = arith.constant 0 : index
    %c0_78 = arith.constant 0 : index
    %147 = vector.load %arg22[%c0_77, %c0_78] : memref<2x32xf32, #tpu.memory_space<vmem>>, vector<2x32xf32>
    tpu.vector_store %arg22[%c0_77, %c0_78], %146 {strides = array<i32>} : memref<2x32xf32, #tpu.memory_space<vmem>>, vector<2x32xf32>,
    return
  }
}

</mosaic_0001>

<bundles_post_ra>
// kernel: network_forward.1
= control target key start
LH: loop header
LB: loop body
LE: loop exit
PB: predicated region body
PF: predicated region fallthrough
CT: control target
= control target key end

     0   :  { %s2436_s0 = inlined_call_operand.vmem [shape: f32[37,512], index: 0, kind: input, shape index: {}]   ;;  %s2437_s1 = inlined_call_operand.vmem [shape: f32[16,37], index: 1, kind: input, shape index: {}]   ;;  %s2438_s2 = inlined_call_operand.vmem [shape: f32[512,2], index: 2, kind: input, shape index: {}]   ;;  %s2439_s3 = inlined_call_operand.vmem [shape: f32[16,64], index: 3, kind: input, shape index: {}]   ;;  %s2440_s4 = inlined_call_operand.vmem [shape: f32[1,64], index: 4, kind: input, shape index: {}]   ;;  %s2441_s5 = inlined_call_operand.vmem [shape: f32[1,32], index: 5, kind: input, shape index: {}]   ;;  %s2442_s6 = inlined_call_operand.vmem [shape: f32[6,5], index: 6, kind: input, shape index: {}]   ;;  %s2443_s7 = inlined_call_operand.vmem [shape: f32[2,6], index: 7, kind: input, shape index: {}]   ;;  %s2444_s8 = inlined_call_operand.vmem [shape: f32[1,32], index: 8, kind: input, shape index: {}]   ;;  %s2445_s9 = inlined_call_operand.vmem [shape: f32[1,32], index: 9, kind: input, shape index: {}]   ;;  %s2446_s10 = inlined_call_operand.vmem [shape: f32[32,32], index: 10, kind: input, shape index: {}]   ;;  %s2447_s11 = inlined_call_operand.vmem [shape: f32[1,32], index: 11, kind: input, shape index: {}]   ;;  %s2448_s12 = inlined_call_operand.vmem [shape: f32[32,64], index: 12, kind: input, shape index: {}]   ;;  %s2449_s13 = inlined_call_operand.vmem [shape: f32[1,64], index: 13, kind: input, shape index: {}]   ;;  %s2450_s14 = inlined_call_operand.vmem [shape: f32[32,32], index: 14, kind: input, shape index: {}]   ;;  %s2451_s15 = inlined_call_operand.vmem [shape: f32[1,32], index: 15, kind: input, shape index: {}]   ;;  %s2452_s16 = inlined_call_operand.vmem [shape: f32[1,32], index: 16, kind: input, shape index: {}]   ;;  %s2453_s17 = inlined_call_operand.vmem [shape: f32[1,32], index: 17, kind: input, shape index: {}]   ;;  %s2454_s18 = inlined_call_operand.vmem [shape: f32[32,128], index: 18, kind: input, shape index: {}]   ;;  %s2455_s19 = inlined_call_operand.vmem [shape: f32[1,128], index: 19, kind: input, shape index: {}]   ;;  %s2456_s20 = inlined_call_operand.vmem [shape: f32[128,32], index: 20, kind: input, shape index: {}]   ;;  %s2457_s21 = inlined_call_operand.vmem [shape: f32[1,32], index: 21, kind: input, shape index: {}]   ;;  %s2458_s22 = inlined_call_operand.hbm [shape: f32[2,32], index: 22, kind: output, shape index: {}]  }
   0x1   :  { %2463 = sst [smem:[#allocation5_spill]] %s2436_s0 }
   0x2   :  { %2464 = sst [smem:[#allocation6_spill]] %s2437_s1 }
   0x3   :  { %2465 = sst [smem:[#allocation7_spill]] %s2438_s2 }
   0x4   :  { %2466 = sst [smem:[#allocation8_spill]] %s2439_s3 }
   0x5   :  { %2467 = sst [smem:[#allocation9_spill]] %s2440_s4 }
   0x6   :  { %2468 = sst [smem:[#allocation10_spill]] %s2441_s5 }
   0x7   :  { %2469 = sst [smem:[#allocation11_spill]] %s2442_s6 }
   0x8   :  { %s2470_s29 = sld [smem:[#allocation5_spill]]  ;;  %v1824_v7 = vmov 0.0   ;;  %vm101_vm0 = vcmask 1044480   ;;  %s2471_s1 = sld [smem:[#allocation7_spill]]  ;;  %vm94_vm1 = vcmask 302080  }
   0x9   :  { %178 = vmatprep.mubr.f32.mxu1 %v1824_v7  ;;  %s2472_s25 = sld [smem:[#allocation6_spill]] }
   0xe   :  { %v75_v0 = vld [vmem:[%s2470_s29 + $0x8] sm:$0xff]  ;;  %v74_v2 = vld [vmem:[%s2470_s29] sm:$0xff]  ;;  %v77_v14 = vld [vmem:[%s2470_s29 + $0x18] sm:$0xff] }
   0xf   :  { %v79_v1 = vld [vmem:[%s2470_s29 + $0x28] sm:$0xff]  ;;  %v78_v4 = vld [vmem:[%s2470_s29 + $0x20] sm:$0xff]  ;;  %v81_v15 = vld [vmem:[%s2470_s29 + $0x38] sm:$0xff] }
  0x10   :  { %v1652_v3 = vpack.c.bf16 %v79_v1, %v75_v0  ;;  %v83_v5 = vld [vmem:[%s2470_s29 + $0x48] sm:$0xff]  ;;  %v1654_v8 = vpack.c.bf16 %v78_v4, %v74_v2  ;;  %v82_v10 = vld [vmem:[%s2470_s29 + $0x40] sm:$0xff]  ;;  %v76_v16 = vld [vmem:[%s2470_s29 + $0x10] sm:$0xff]  ;;  %v1660_v27 = vpack.c.bf16 %v81_v15, %v77_v14 }
  0x11   :  { %v87_v6 = vld [vmem:[%s2470_s29 + $0x68] sm:$0xff]  ;;  %v86_v11 = vld [vmem:[%s2470_s29 + $0x60] sm:$0xff]  ;;  %v80_v17 = vld [vmem:[%s2470_s29 + $0x30] sm:$0xff] }
  0x12   :  { %v1656_v9 = vpack.c.bf16 %v87_v6, %v83_v5  ;;  %1653 = vmatprep.subr.bf16.mxu1 %v1652_v3  ;;  %v1658_v12 = vpack.c.bf16 %v86_v11, %v82_v10  ;;  %v91_v13 = vld [vmem:[%s2470_s29 + $0x88] sm:$0x1f]  ;;  %v85_v18 = vld [vmem:[%s2470_s29 + $0x58] sm:$0xff]  ;;  %v90_v19 = vld [vmem:[%s2470_s29 + $0x80] sm:$0x1f]  ;;  %v1662_v33 = vpack.c.bf16 %v80_v17, %v76_v16 }
  0x13   :  { %1655 = vmatpush1.bf16.msra.mxu1 %v1654_v8  ;;  %v89_v20 = vld [vmem:[%s2470_s29 + $0x78] sm:$0xff]  ;;  %v292_v21 = vld [vmem:[%s2471_s1 + $0x80] sm:$0xff]  ;;  %v293_v22 = vld [vmem:[%s2471_s1 + $0x88] sm:$0xff] }
  0x14   :  { %1657 = vmatprep.subr.bf16.mxu1 %v1656_v9  ;;  %v1668_v23 = vpack.c.bf16 %v293_v22, %v292_v21  ;;  %v276_v24 = vld [vmem:[%s2471_s1] sm:$0xff]  ;;  %v277_v25 = vld [vmem:[%s2471_s1 + $0x8] sm:$0xff]  ;;  %v294_v26 = vld [vmem:[%s2471_s1 + $0x90] sm:$0xff]  ;;  %v1664_v37 = vpack.c.bf16 %v89_v20, %v85_v18 }
  0x15   :  { %v1670_v28 = vpack.c.bf16 %v277_v25, %v276_v24  ;;  %v295_v29 = vld [vmem:[%s2471_s1 + $0x98] sm:$0xff]  ;;  %v278_v30 = vld [vmem:[%s2471_s1 + $0x10] sm:$0xff]  ;;  %v72_v32 = vld [vmem:[%s2472_s25] sm:$0xff] }
  0x16   :  { %v279_v31 = vld [vmem:[%s2471_s1 + $0x18] sm:$0xff]  ;;  %1669 = vmatprep.subr.bf16.mxu0 %v1668_v23  ;;  %v1672_v34 = vpack.c.bf16 %v295_v29, %v294_v26  ;;  %v296_v35 = vld [vmem:[%s2471_s1 + $0xa0] sm:$0xff]  ;;  %v297_v36 = vld [vmem:[%s2471_s1 + $0xa8] sm:$0xff] }
  0x17   :  { %1659 = vmatpush1.bf16.msra.mxu1 %v1658_v12  ;;  %v84_v38 = vld [vmem:[%s2470_s29 + $0x50] sm:$0xff]  ;;  %1671 = vmatpush3.bf16.msra.mxu0 %v1670_v28  ;;  %v1674_v40 = vpack.c.bf16 %v279_v31, %v278_v30  ;;  %v1676_v41 = vpack.c.bf16 %v297_v36, %v296_v35  ;;  %v280_v42 = vld [vmem:[%s2471_s1 + $0x20] sm:$0xff]  ;;  %v281_v43 = vld [vmem:[%s2471_s1 + $0x28] sm:$0xff] }
  0x18   :  { %1403 = vmatprep.subr.msk.mxu1 %vm101_vm0, %v91_v13  ;;  %v88_v39 = vld [vmem:[%s2470_s29 + $0x70] sm:$0xff]  ;;  %1673 = vmatprep.subr.bf16.mxu0 %v1672_v34  ;;  %v299_v45 = vld [vmem:[%s2471_s1 + $0xb8] sm:$0xff]  ;;  %v73_v46 = vld [vmem:[%s2472_s25 + $0x8] sm:$0xff]  ;;  %v1678_v48 = vpack.c.bf16 %v281_v43, %v280_v42 }
  0x19   :  { %v298_v44 = vld [vmem:[%s2471_s1 + $0xb0] sm:$0xff]  ;;  %v1666_v47 = vpack.c.bf16 %v88_v39, %v84_v38  ;;  %v93_v49 = vld [vmem:[%s2470_s29 + $0x98] sm:$0x1f]  ;;  %v324_v50 = vld [vmem:[%s2471_s1 + $0x180] sm:$0xff] }
  0x1a   :  { %v325_v51 = vld [vmem:[%s2471_s1 + $0x188] sm:$0xff]  ;;  %v1680_v52 = vpack.c.bf16 %v299_v45, %v298_v44  ;;  %v308_v53 = vld [vmem:[%s2471_s1 + $0x100] sm:$0xff]  ;;  %v282_v55 = vld [vmem:[%s2471_s1 + $0x30] sm:$0xff] }
  0x1b   :  { %1404 = vmatpush1.msk.msra.mxu1 %vm101_vm0, %v90_v19  ;;  %1675 = vmatpush3.bf16.msra.mxu0 %v1674_v40  ;;  %v309_v54 = vld [vmem:[%s2471_s1 + $0x108] sm:$0xff]  ;;  %v283_v56 = vld [vmem:[%s2471_s1 + $0x38] sm:$0xff]  ;;  %v326_v57 = vld [vmem:[%s2471_s1 + $0x190] sm:$0xff]  ;;  %v1700_v60 = vpack.c.bf16 %v325_v51, %v324_v50 }
  0x1c   :  { %1405 = vmatmul.mubr.msk.f32.vlgmr.msra.gmra.mrb[0].mxu1 %vm94_vm1, %v72_v32  ;;  %1661 = vmatprep.subr.bf16.mxu1 %v1660_v27  ;;  %v327_v58 = vld [vmem:[%s2471_s1 + $0x198] sm:$0xff]  ;;  %v92_v59 = vld [vmem:[%s2470_s29 + $0x90] sm:$0x1f]  ;;  %v300_v61 = vld [vmem:[%s2471_s1 + $0xc0] sm:$0xff]  ;;  %v1702_v63 = vpack.c.bf16 %v309_v54, %v308_v53  ;;  %v1682_v1 = vpack.c.bf16 %v283_v56, %v282_v55 }
  0x1d   :  { %1663 = vmatpush1.bf16.msra.mxu1 %v1662_v33  ;;  %184 = vmatprep.mubr.f32.mxu1 %v1824_v7  ;;  %v301_v62 = vld [vmem:[%s2471_s1 + $0xc8] sm:$0xff]  ;;  %v310_v0 = vld [vmem:[%s2471_s1 + $0x110] sm:$0xff]  ;;  %v1704_v2 = vpack.c.bf16 %v327_v58, %v326_v57  ;;  %v311_v3 = vld [vmem:[%s2471_s1 + $0x118] sm:$0xff] }
  0x1e   :  { %1665 = vmatprep.subr.bf16.mxu1 %v1664_v37  ;;  %1677 = vmatprep.subr.bf16.mxu0 %v1676_v41  ;;  %v284_v4 = vld [vmem:[%s2471_s1 + $0x40] sm:$0xff]  ;;  %v285_v5 = vld [vmem:[%s2471_s1 + $0x48] sm:$0xff]  ;;  %v1684_v6 = vpack.c.bf16 %v301_v62, %v300_v61 }
  0x1f   :  { %1679 = vmatpush3.bf16.msra.mxu0 %v1678_v48  ;;  %v328_v8 = vld [vmem:[%s2471_s1 + $0x1a0] sm:$0xff]  ;;  %v329_v9 = vld [vmem:[%s2471_s1 + $0x1a8] sm:$0xff] }
  0x20   :  { %1406 = vmatmul.mubr.msk.f32.gmra.mrb[2].mxu1 %vm94_vm1, %v73_v46  ;;  %1681 = vmatprep.subr.bf16.mxu0 %v1680_v52 }
  0x21   :  { %1667 = vmatpush1.bf16.msra.mxu1 %v1666_v47  ;;  %255 = vmatprep.mubr.f32.mxu1 %v1824_v7 }
  0x22   :  { %1407 = vmatprep.subr.msk.mxu1 %vm101_vm0, %v93_v49 }
  0x25   :  { %1408 = vmatpush1.msk.msra.mxu1 %vm101_vm0, %v92_v59 }
  0x26   :  { %27 = vsyncpa [#allocation3], 0  ;;  %1409 = vmatmul.mubr.msk.f32.vlgmr.msra.gmra.mrb[4].mxu1 %vm94_vm1, %v72_v32  ;;  %1701 = vmatprep.subr.bf16.mxu1 %v1700_v60  ;;  %v302_v10 = vld [vmem:[%s2471_s1 + $0xd0] sm:$0xff]  ;;  %v303_v11 = vld [vmem:[%s2471_s1 + $0xd8] sm:$0xff]  ;;  %v1706_v12 = vpack.c.bf16 %v311_v3, %v310_v0  ;;  %v1686_v13 = vpack.c.bf16 %v285_v5, %v284_v4  ;;  %v1708_v14 = vpack.c.bf16 %v329_v9, %v328_v8  ;;  %s2473_s2 = sld [smem:[#allocation8_spill]]  ;;  %vm1826_vm2 = vmmov 0  }
  0x27   :  { %261 = vmatprep.mubr.f32.mxu1 %v1824_v7  ;;  %1703 = vmatpush3.bf16.msra.mxu1 %v1702_v63  ;;  %v312_v15 = vld [vmem:[%s2471_s1 + $0x120] sm:$0xff]  ;;  %v313_v16 = vld [vmem:[%s2471_s1 + $0x128] sm:$0xff]  ;;  %v286_v17 = vld [vmem:[%s2471_s1 + $0x50] sm:$0xff]  ;;  %v1688_v18 = vpack.c.bf16 %v303_v11, %v302_v10  ;;  %vm531_vm3 = vcmask 130048   ;;  %s2474_s4 = sld [smem:[#allocation9_spill]]  ;;  %s1827_s29 = smov 96  }
  0x28   :  { %1683 = vmatpush3.bf16.msra.mxu0 %v1682_v1  ;;  %1705 = vmatprep.subr.bf16.mxu1 %v1704_v2  ;;  %v287_v19 = vld [vmem:[%s2471_s1 + $0x58] sm:$0xff]  ;;  %v330_v20 = vld [vmem:[%s2471_s1 + $0x1b0] sm:$0xff]  ;;  %v304_v22 = vld [vmem:[%s2471_s1 + $0xe0] sm:$0xff]  ;;  %v1710_v24 = vpack.c.bf16 %v313_v16, %v312_v15  ;;  %s2475_s5 = sld [smem:[#allocation10_spill]]  ;;  %vm613_vm4 = vcmask 1040384   ;;  %vm615_vm5 = vcmask 1042432  }
  0x29   :  { %1685 = vmatprep.subr.bf16.mxu0 %v1684_v6  ;;  %v331_v21 = vld [vmem:[%s2471_s1 + $0x1b8] sm:$0xff]  ;;  %v305_v23 = vld [vmem:[%s2471_s1 + $0xe8] sm:$0xff]  ;;  %v1690_v25 = vpack.c.bf16 %v287_v19, %v286_v17  ;;  %v314_v27 = vld [vmem:[%s2471_s1 + $0x130] sm:$0xff]  ;;  %v1825_v19 = vmov 0.0|0.0   ;;  %s2476_s25 = sld [smem:[#allocation11_spill]]  ;;  %vm618_vm6 = vcmask 39936  }
  0x2a   :  { %1410 = vmatmul.mubr.msk.f32.gmra.mrb[6].mxu1 %vm94_vm1, %v73_v46  ;;  %v1712_v26 = vpack.c.bf16 %v331_v21, %v330_v20  ;;  %v315_v28 = vld [vmem:[%s2471_s1 + $0x138] sm:$0xff]  ;;  %v288_v29 = vld [vmem:[%s2471_s1 + $0x60] sm:$0xff]  ;;  %v1692_v30 = vpack.c.bf16 %v305_v23, %v304_v22  ;;  %v289_v31 = vld [vmem:[%s2471_s1 + $0x68] sm:$0xff]  ;;  %vm811_vm7 = vcmask 253952   ;;  %vm697_vm8 = vcmask 259072  }
  0x2b   :  { %1707 = vmatpush3.bf16.msra.mxu1 %v1706_v12  ;;  %v332_v32 = vld [vmem:[%s2471_s1 + $0x1c0] sm:$0xff]  ;;  %v333_v33 = vld [vmem:[%s2471_s1 + $0x1c8] sm:$0xff]  ;;  %v1714_v34 = vpack.c.bf16 %v315_v28, %v314_v27  ;;  %v1694_v35 = vpack.c.bf16 %v289_v31, %v288_v29  ;;  %v306_v40 = vld [vmem:[%s2471_s1 + $0xf0] sm:$0xff]  ;;  %vm737_vm9 = vcmask 261120   ;;  %vm1006_vm10 = vcmask 1045504  }
  0x2c   :  { %1687 = vmatpush3.bf16.msra.mxu0 %v1686_v13  ;;  %1709 = vmatprep.subr.bf16.mxu1 %v1708_v14  ;;  %v1716_v36 = vpack.c.bf16 %v333_v33, %v332_v32  ;;  %v316_v37 = vld [vmem:[%s2471_s1 + $0x140] sm:$0xff]  ;;  %v317_v38 = vld [vmem:[%s2471_s1 + $0x148] sm:$0xff]  ;;  %v307_v41 = vld [vmem:[%s2471_s1 + $0xf8] sm:$0xff]  ;;  %vm988_vm12 = vcmask 41984   ;;  %vm1002_vm13 = vcmask 48128   ;;  %vm1173_vm14 = vcmask 254976  }
  0x2d   :  { %1689 = vmatprep.subr.bf16.mxu0 %v1688_v18  ;;  %v1718_v39 = vpack.c.bf16 %v317_v38, %v316_v37  ;;  %v1696_v42 = vpack.c.bf16 %v307_v41, %v306_v40  ;;  %v290_v43 = vld [vmem:[%s2471_s1 + $0x70] sm:$0xff]  ;;  %v291_v44 = vld [vmem:[%s2471_s1 + $0x78] sm:$0xff]  ;;  %v336_v52 = vld [vmem:[%s2471_s1 + $0x1e0] sm:$0xff] }
  0x2e   :  { %v1698_v45 = vpack.c.bf16 %v291_v44, %v290_v43  ;;  %v334_v46 = vld [vmem:[%s2471_s1 + $0x1d0] sm:$0xff]  ;;  %v335_v47 = vld [vmem:[%s2471_s1 + $0x1d8] sm:$0xff]  ;;  %v337_v53 = vld [vmem:[%s2471_s1 + $0x1e8] sm:$0xff] }
  0x2f   :  { %1711 = vmatpush3.bf16.msra.mxu1 %v1710_v24  ;;  %v1720_v48 = vpack.c.bf16 %v335_v47, %v334_v46  ;;  %v318_v49 = vld [vmem:[%s2471_s1 + $0x150] sm:$0xff]  ;;  %v319_v50 = vld [vmem:[%s2471_s1 + $0x158] sm:$0xff]  ;;  %v1724_v54 = vpack.c.bf16 %v337_v53, %v336_v52  ;;  %v320_v55 = vld [vmem:[%s2471_s1 + $0x160] sm:$0xff] }
  0x30   :  { %1691 = vmatpush3.bf16.msra.mxu0 %v1690_v25  ;;  %1713 = vmatprep.subr.bf16.mxu1 %v1712_v26  ;;  %v1722_v51 = vpack.c.bf16 %v319_v50, %v318_v49  ;;  %v321_v56 = vld [vmem:[%s2471_s1 + $0x168] sm:$0xff]  ;;  %v338_v58 = vld [vmem:[%s2471_s1 + $0x1f0] sm:$0xff]  ;;  %v339_v59 = vld [vmem:[%s2471_s1 + $0x1f8] sm:$0xff] }
  0x31   :  { %1693 = vmatprep.subr.bf16.mxu0 %v1692_v30  ;;  %v1726_v57 = vpack.c.bf16 %v321_v56, %v320_v55  ;;  %v1728_v60 = vpack.c.bf16 %v339_v59, %v338_v58  ;;  %v322_v61 = vld [vmem:[%s2471_s1 + $0x170] sm:$0xff]  ;;  %v323_v62 = vld [vmem:[%s2471_s1 + $0x178] sm:$0xff]  ;;  %v490_v17 = vld [vmem:[%s2473_s2] sm:$0xff] }
  0x32   :  { %v1730_v63 = vpack.c.bf16 %v323_v62, %v322_v61  ;;  %v491_v18 = vld [vmem:[%s2473_s2 + $0x8] sm:$0xff]  ;;  %v726_v61 = vld [vmem:[%s2448_s12] sm:$0xff] }
  0x33   :  { %1715 = vmatpush3.bf16.msra.mxu1 %v1714_v34  ;;  %v1733_v20 = vpack.c.bf16 %v491_v18, %v490_v17  ;;  %v727_v62 = vld [vmem:[%s2448_s12 + $0x8] sm:$0xff] }
  0x34   :  { %1695 = vmatpush3.bf16.msra.mxu0 %v1694_v35  ;;  %1717 = vmatprep.subr.bf16.mxu1 %v1716_v36  ;;  %v1411_v36 = vld [vmem:[%s2474_s4] ss:$0 sm:$0xff] }
  0x35   :  { %1697 = vmatprep.subr.bf16.mxu0 %v1696_v42  ;;  %v2236_v42 = vld [vmem:[%s2475_s5] sm:$0x1] }
  0x36   :  { %v812_v47 = vsel %vm811_vm7, %v2236_v42, 0.0 }
  0x37   :  { %1719 = vmatpush3.bf16.msra.mxu1 %v1718_v39 }
  0x38   :  { %1699 = vmatpush3.bf16.msra.mxu0 %v1698_v45  ;;  %1721 = vmatprep.subr.bf16.mxu1 %v1720_v48  ;;  %v617_v45 = vld [vmem:[%s2476_s25] sm:$0x3f] }
  0x39   :  { %1735 = vmatprep.subr.bf16.mxu0 %v1825_v19 }
  0x3b   :  { %1723 = vmatpush3.bf16.msra.mxu1 %v1722_v51 }
  0x3c   :  { %1725 = vmatprep.subr.bf16.mxu1 %v1724_v54 }
  0x3f   :  { %1727 = vmatpush3.bf16.msra.mxu1 %v1726_v57 }
  0x40   :  { %1729 = vmatprep.subr.bf16.mxu1 %v1728_v60 }
  0x43   :  { %1731 = vmatpush3.bf16.msra.mxu1 %v1730_v63  ;;  %v1736_v63 = vpack.c.bf16 %v727_v62, %v726_v61 }
  0x44   :  { %1732 = vmatprep.subr.bf16.mxu1 %v1825_v19 }
  0xef   :  { %v180_v0 = vpop.f32.mrb[0].mxu1 }
  0xf0   :  { %v268_v1 = vmax.f32 %v180_v0, 0.0  ;;  %v182_v2 = vpop.f32.mrb[1].mxu1  ;;  %v728_v0 = vld [vmem:[%s2448_s12 + $0x10] sm:$0xff] }
  0xf1   :  { %v269_v3 = vmax.f32 %v182_v2, 0.0  ;;  %v827_v2 = vld [vmem:[%s2446_s10] sm:$0xff] }
  0xf3   :  { %v186_v4 = vpop.f32.mrb[2].mxu1  ;;  %404 = vmatprep.mubr.f32.mxu0 %v269_v3 }
  0xf4   :  { %v272_v5 = vmax.f32 %v186_v4, 0.0  ;;  %v188_v6 = vpop.f32.mrb[3].mxu1  ;;  %405 = vmatmul.mubr.f32.vlgmr.msra.gmra.mrb[0].mxu0 %v268_v1  ;;  %v729_v1 = vld [vmem:[%s2448_s12 + $0x18] sm:$0xff]  ;;  %v828_v4 = vld [vmem:[%s2446_s10 + $0x8] sm:$0xff] }
  0xf5   :  { %v273_v8 = vmax.f32 %v188_v6, 0.0  ;;  %1737 = vmatpush3.bf16.msra.mxu0 %v1736_v63  ;;  %v1739_v3 = vpack.c.bf16 %v729_v1, %v728_v0  ;;  %v829_v6 = vld [vmem:[%s2446_s10 + $0x10] sm:$0xff] }
  0xf6   :  { %1738 = vmatprep.subr.bf16.mxu0 %v1825_v19 }
  0xf7   :  { %409 = vmatprep.mubr.f32.mxu0 %v273_v8  ;;  %v830_v8 = vld [vmem:[%s2446_s10 + $0x18] sm:$0xff] }
  0xf8   :  { %410 = vmatmul.mubr.f32.gmra.mrb[2].mxu0 %v272_v5  ;;  %v1742_v5 = vpack.c.bf16 %v828_v4, %v827_v2  ;;  %v1423_v2 = vld [vmem:[%s2451_s15] ss:$0 sm:$0xff] }
  0xf9   :  { %v257_v9 = vpop.f32.mrb[4].mxu1  ;;  %1571 = vmatprep.mubr.msk.f32.mxu0 %vm1826_vm2, %v1824_v7  ;;  %1740 = vmatpush3.bf16.msra.mxu0 %v1739_v3 }
  0xfa   :  { %v259_v10 = vpop.f32.mrb[5].mxu1  ;;  %v270_v12 = vmax.f32 %v257_v9, 0.0  ;;  %1585 = vmatprep.subr.mxu0 %v1824_v7  ;;  %v1745_v9 = vpack.c.bf16 %v830_v8, %v829_v6 }
  0xfb   :  { %v271_v11 = vmax.f32 %v259_v10, 0.0 }
  0xfd   :  { %v263_v13 = vpop.f32.mrb[6].mxu1  ;;  %479 = vmatprep.mubr.f32.mxu1 %v271_v11 }
  0xfe   :  { %v265_v14 = vpop.f32.mrb[7].mxu1  ;;  %480 = vmatmul.mubr.f32.vlgmr.msra.gmra.mrb[8].mxu1 %v270_v12  ;;  %v274_v16 = vmax.f32 %v263_v13, 0.0  ;;  %v713_v12 = vlaneseq }
  0xff   :  { %v275_v15 = vmax.f32 %v265_v14, 0.0  ;;  %1734 = vmatpush3.bf16.msra.mxu1 %v1733_v20  ;;  %v695_v20 = vld [vmem:[%s2444_s8] sm:$0x1] }
 0x100   :  { %1558 = vmatprep.subr.mxu1 %v1824_v7 }
 0x101   :  { %484 = vmatprep.mubr.f32.mxu1 %v275_v15 }
 0x102   :  { %485 = vmatmul.mubr.f32.gmra.mrb[10].mxu1 %v274_v16  ;;  %v714_v16 = vshrl.u32 %v713_v12, 7  ;;  %v1202_v12 = vld [vmem:[%s2454_s18 + $0x8] sm:$0xff] }
 0x103   :  { %1555 = vmatprep.mubr.msk.f32.mxu1 %vm1826_vm2, %v1824_v7 }
 0x104   :  { %v2278_v18 = vsub.s32 0, %v714_v16 }
 0x106   :  { %v1160_v0 = vrot.slane %v2236_v42, %v2278_v18 }
 0x1c7   :  { %v1461_v21 = vpop.f32.mrb[0].mxu0 }
 0x1c8   :  { %v1462_v22 = vpop.f32.mrb[1].mxu0 }
 0x1c9   :  { %v1463_v23 = vadd.f32 %v1462_v22, %v1461_v21  ;;  %v696_v21 = vld [vmem:[%s2445_s9] sm:$0x1]  ;;  %v716_v22 = vrot.slane %v695_v20, %v2278_v18 }
 0x1cb   :  { %v1464_v24 = vpop.f32.mrb[2].mxu0 }
 0x1cc   :  { %v1465_v25 = vpop.f32.mrb[3].mxu0 }
 0x1cd   :  { %v1466_v26 = vadd.f32 %v1465_v25, %v1464_v24  ;;  %v723_v24 = vrot.slane %v696_v21, %v2278_v18 }
 0x1d1   :  { %v1499_v27 = vpop.f32.mrb[8].mxu1 }
 0x1d2   :  { %v1500_v28 = vpop.f32.mrb[9].mxu1 }
 0x1d3   :  { %v1501_v29 = vadd.f32 %v1500_v28, %v1499_v27 }
 0x1d5   :  { %v1502_v30 = vpop.f32.mrb[10].mxu1  ;;  %v482_v31 = vadd.f32 %v1501_v29, %v1463_v23 }
 0x1d6   :  { %v1503_v32 = vpop.f32.mrb[11].mxu1 }
 0x1d7   :  { %v1504_v33 = vadd.f32 %v1503_v32, %v1502_v30  ;;  %499 = vxpose.xlu0.b32.start [1/2] (short) (narrow) %v482_v31, 8  ;;  %v1415_v32 = vld [vmem:[%s2449_s13] ss:$0 sm:$0xff] }
 0x1d9   :  { %v487_v34 = vadd.f32 %v1504_v33, %v1466_v26 }
 0x1db   :  { %500 = vxpose.xlu0.b32.end [2/2] (short) (narrow) %v487_v34, 8 }
 0x208   :  { %813 = vadd.xlane.f32.xlu0 %v812_v47 }
 0x257   :  { %v515_v35 = vpop.trf.xlu0 }
 0x258   :  { %1556 = vmatmul.mubr.msk.f32.vlgmr.msra.gmra.mrb[12].mxu1 %vm531_vm3, %v515_v35 }
 0x259   :  { %1560 = vmatprep.mubr.msk.f32.mxu1 %vm1826_vm2, %v1824_v7 }
 0x295   :  { %v814_v51 = vpop.xlane.xlu0 %813 }
 0x296   :  { %v815_v52 = vmul.f32 0.03125, %v814_v51 }
 0x298   :  { %v816_v55 = vsub.f32 %v2236_v42, %v815_v52 }
 0x29a   :  { %v817_v58 = vmul.f32 %v816_v55, %v816_v55 }
 0x29c   :  { %v818_v60 = vsel %vm811_vm7, %v817_v58, 0.0 }
 0x32b   :  { %v601_v37 = vpop.f32.mrb[12].mxu1 }
 0x32c   :  { %v602_v38 = vadd.f32 %v1411_v36, %v601_v37  ;;  %v1557_v39 = vpop.f32.mrb[13].mxu1  ;;  %v831_v36 = vld [vmem:[%s2447_s11] sm:$0x1] }
 0x32e   :  { %v609_v40 = vrot.slane %v602_v38, 5  ;;  %v607_v41 = vrot.slane %v602_v38, 7 }
 0x330   :  { %610 = vrot.lane.b32.xlu1 %v609_v40, %s1827_s29  ;;  %v614_v44 = vsel %vm613_vm4, %v2236_v42, %v607_v41  ;;  %v985_v41 = vld [vmem:[%s2443_s7] sm:$0x3] }
 0x331   :  { %vm986_vm11 = vcmp.gt.f32.partialorder %v985_v41, 0.0 }
 0x3a2   :  { %v611_v43 = vpop.permute.xlu1 %610 }
 0x3a3   :  { %v616_v46 = vsel %vm615_vm5, %v614_v44, %v611_v43 }
 0x3a4   :  { %1559 = vmatpush3.msk.msra.mxu1 %vm101_vm0, %v616_v46 }
 0x3a5   :  { %1561 = vmatmul.mubr.msk.f32.vlgmr.msra.gmra.mrb[14].mxu1 %vm618_vm6, %v617_v45  ;;  %1741 = vmatprep.subr.bf16.mxu1 %v1825_v19 }
 0x3a6   :  { %1582 = vmatprep.mubr.msk.f32.mxu1 %vm1826_vm2, %v1824_v7  ;;  %1743 = vmatpush3.bf16.msra.mxu1 %v1742_v5 }
 0x3a7   :  { %1744 = vmatprep.subr.bf16.mxu1 %v1825_v19 }
 0x3aa   :  { %1746 = vmatpush3.bf16.msra.mxu1 %v1745_v9 }
 0x3ab   :  { %1590 = vmatprep.subr.mxu1 %v1824_v7 }
 0x478   :  { %v691_v48 = vpop.f32.mrb[14].mxu1 }
 0x479   :  { %v698_v49 = vsel %vm697_vm8, %v691_v48, 0.0  ;;  %v1562_v50 = vpop.f32.mrb[15].mxu1 }
 0x47a   :  { %699 = vadd.xlane.f32.xlu1 %v698_v49 }
 0x507   :  { %v700_v53 = vpop.xlane.xlu1 %699 }
 0x508   :  { %v702_v54 = vmul.f32 0.03125, %v700_v53  ;;  %v1079_v53 = vld [vmem:[%s2450_s14] sm:$0xff] }
 0x50a   :  { %v703_v56 = vsub.f32 %v691_v48, %v702_v54  ;;  %v1080_v54 = vld [vmem:[%s2450_s14 + $0x8] sm:$0xff] }
 0x50c   :  { %v704_v57 = vmul.f32 %v703_v56, %v703_v56 }
 0x50e   :  { %v705_v59 = vsel %vm697_vm8, %v704_v57, 0.0  ;;  %v1082_v57 = vld [vmem:[%s2450_s14 + $0x18] sm:$0xff] }
 0x50f   :  { %706 = vadd.xlane.f32.xlu1 %v705_v59 }
 0x513   :  { %819 = vadd.xlane.f32.xlu1 %v818_v60 }
 0x59c   :  { %v707_v10 = vpop.xlane.xlu1 %706 }
 0x59d   :  { %v708_v11 = vmul.f32 0.03125, %v707_v10 }
 0x59f   :  { %v709_v13 = vadd.f32 1e-05, %v708_v11  ;;  %v1201_v11 = vld [vmem:[%s2454_s18] sm:$0xff] }
 0x5a0   :  { %v820_v14 = vpop.xlane.xlu1 %819 }
 0x5a1   :  { %1788 = vrsqrt.f32 %v709_v13  ;;  %v821_v15 = vmul.f32 0.03125, %v820_v14  ;;  %v1754_v13 = vpack.c.bf16 %v1202_v12, %v1201_v11  ;;  %v1203_v14 = vld [vmem:[%s2454_s18 + $0x10] sm:$0xff] }
 0x5a3   :  { %v822_v17 = vadd.f32 1e-05, %v821_v15  ;;  %v1204_v15 = vld [vmem:[%s2454_s18 + $0x18] sm:$0xff] }
 0x5a4   :  { %v1757_v16 = vpack.c.bf16 %v1204_v15, %v1203_v14 }
 0x5a5   :  { %1790 = vrsqrt.f32 %v822_v17  ;;  %v1294_v17 = vld [vmem:[%s2456_s20] sm:$0xff] }
 0x5ab   :  { %v1789_v23 = vpop.eup %1788 }
 0x5ac   :  { %v711_v25 = vmul.f32 %v1789_v23, %v703_v56  ;;  %v1748_v56 = vpack.c.bf16 %v1080_v54, %v1079_v53 }
 0x5ae   :  { %v718_v26 = vmul.f32 %v716_v22, %v711_v25  ;;  %v1424_v25 = vld [vmem:[%s2452_s16] ss:$0 sm:$0xff] }
 0x5af   :  { %v1791_v27 = vpop.eup %1790 }
 0x5b0   :  { %v725_v28 = vadd.f32 %v723_v24, %v718_v26  ;;  %v824_v29 = vmul.f32 %v1791_v27, %v816_v55  ;;  %v1081_v55 = vld [vmem:[%s2450_s14 + $0x10] sm:$0xff]  ;;  %v1425_v27 = vld [vmem:[%s2453_s17] ss:$0 sm:$0xff] }
 0x5b1   :  { %v1751_v58 = vpack.c.bf16 %v1082_v57, %v1081_v55 }
 0x5b2   :  { %1572 = vmatmul.mubr.msk.f32.vlgmr.msra.gmra.mrb[4].mxu0 %vm737_vm9, %v725_v28  ;;  %v825_v30 = vmul.f32 %v824_v29, %v695_v20 }
 0x5b3   :  { %1587 = vmatprep.mubr.msk.f32.mxu0 %vm1826_vm2, %v1824_v7 }
 0x5b4   :  { %v826_v31 = vadd.f32 %v825_v30, %v696_v21  ;;  %v1296_v30 = vld [vmem:[%s2456_s20 + $0x10] sm:$0xff] }
 0x5b6   :  { %1583 = vmatmul.mubr.msk.f32.vlgmr.msra.gmra.mrb[16].mxu1 %vm737_vm9, %v826_v31  ;;  %v1297_v31 = vld [vmem:[%s2456_s20 + $0x18] sm:$0xff] }
 0x5b7   :  { %1592 = vmatprep.mubr.msk.f32.mxu1 %vm1826_vm2, %v1824_v7 }
 0x685   :  { %v807_v33 = vpop.f32.mrb[4].mxu0 }
 0x686   :  { %v808_v34 = vadd.f32 %v1415_v32, %v807_v33  ;;  %v1573_v35 = vpop.f32.mrb[5].mxu0  ;;  %v1763_v32 = vpack.c.bf16 %v1297_v31, %v1296_v30  ;;  %v1298_v33 = vld [vmem:[%s2456_s20 + $0x20] sm:$0xff] }
 0x688   :  { %1000 = vrot.lane.b32.xlu0 %v808_v34, %s1827_s29  ;;  %1586 = vmatpush3.xpose.msk.msra.mxu0 %vm737_vm9, %v808_v34  ;;  %v1299_v34 = vld [vmem:[%s2456_s20 + $0x28] sm:$0xff] }
 0x689   :  { %v901_v37 = vpop.f32.mrb[16].mxu1  ;;  %1747 = vmatprep.subr.bf16.mxu0 %v1825_v19  ;;  %v1766_v35 = vpack.c.bf16 %v1299_v34, %v1298_v33 }
 0x68a   :  { %v902_v38 = vadd.f32 %v901_v37, %v831_v36  ;;  %v1584_v39 = vpop.f32.mrb[17].mxu1  ;;  %v1300_v36 = vld [vmem:[%s2456_s20 + $0x30] sm:$0xff]  ;;  %v1301_v37 = vld [vmem:[%s2456_s20 + $0x38] sm:$0xff] }
 0x68b   :  { %v1302_v39 = vld [vmem:[%s2456_s20 + $0x40] sm:$0xff] }
 0x68c   :  { %1588 = vmatmul.mubr.msk.f32.vlgmr.msra.gmra.mrb[6].mxu0 %vm737_vm9, %v902_v38  ;;  %v1769_v38 = vpack.c.bf16 %v1301_v37, %v1300_v36 }
 0x68d   :  { %1603 = vmatprep.mubr.msk.f32.mxu0 %vm1826_vm2, %v1824_v7  ;;  %1749 = vmatpush3.bf16.msra.mxu0 %v1748_v56 }
 0x68e   :  { %1750 = vmatprep.subr.bf16.mxu0 %v1825_v19 }
 0x691   :  { %1752 = vmatpush3.bf16.msra.mxu0 %v1751_v58 }
 0x692   :  { %1759 = vmatprep.subr.bf16.mxu0 %v1825_v19 }
 0x6fa   :  { %v1001_v40 = vpop.permute.xlu0 %1000 }
 0x6fb   :  { %1591 = vmatpush3.msk.msra.mxu1 %vm1006_vm10, %v1001_v40  ;;  %v1303_v40 = vld [vmem:[%s2456_s20 + $0x48] sm:$0xff] }
 0x6fc   :  { %1753 = vmatprep.subr.bf16.mxu1 %v1825_v19  ;;  %v1772_v41 = vpack.c.bf16 %v1303_v40, %v1302_v39 }
 0x75f   :  { %v977_v43 = vpop.f32.mrb[6].mxu0 }
 0x760   :  { %v984_v44 = vrot.slane %v977_v43, %v2278_v18  ;;  %v1589_v45 = vpop.f32.mrb[7].mxu0  ;;  %v1295_v18 = vld [vmem:[%s2456_s20 + $0x8] sm:$0xff]  ;;  %v1304_v43 = vld [vmem:[%s2456_s20 + $0x50] sm:$0xff] }
 0x761   :  { %v1760_v20 = vpack.c.bf16 %v1295_v18, %v1294_v17 }
 0x762   :  { %v987_v46 = vsel %vm986_vm11, %v984_v44, -inf  ;;  %v1305_v44 = vld [vmem:[%s2456_s20 + $0x58] sm:$0xff] }
 0x763   :  { %v989_v47 = vsel %vm988_vm12, %v987_v46, -inf  ;;  %v1775_v45 = vpack.c.bf16 %v1305_v44, %v1304_v43 }
 0x764   :  { %990 = vmax.xlane.f32.xlu1 %v989_v47  ;;  %v1307_v47 = vld [vmem:[%s2456_s20 + $0x68] sm:$0xff] }
 0x7f1   :  { %v991_v48 = vpop.xlane.xlu1 %990 }
 0x7f2   :  { %v992_v49 = vsub.f32 %v987_v46, %v991_v48  ;;  %v1306_v46 = vld [vmem:[%s2456_s20 + $0x60] sm:$0xff] }
 0x7f3   :  { %v1778_v48 = vpack.c.bf16 %v1307_v47, %v1306_v46 }
 0x7f4   :  { %v993_v50 = vmul.f32 1.442695, %v992_v49  ;;  %v1308_v49 = vld [vmem:[%s2456_s20 + $0x70] sm:$0xff] }
 0x7f6   :  { %1792 = vpow2.f32 %v993_v50  ;;  %v1309_v50 = vld [vmem:[%s2456_s20 + $0x78] sm:$0xff] }
 0x800   :  { %v1793_v51 = vpop.eup %1792 }
 0x801   :  { %v995_v52 = vsel %vm988_vm12, %v1793_v51, 0.0 }
 0x802   :  { %996 = vadd.xlane.f32.xlu1 %v995_v52  ;;  %v1426_v52 = vld [vmem:[%s2455_s19] ss:$0 sm:$0xff]  ;;  %s1828_s19 = smov [#allocation2]  }
 0x803   :  { %s1395_s16 = sshll.u32 %s1828_s19, 4  ;;  %s1396_s16 = int_to_ptr.vmem [resolvable:$true] %s1395_s16 }
 0x804   :  { %s1800_s23 = scalar_lea.vmem %s1396_s16, 32  ;;  %p1805_p1 = scmp.lt.s32.totalorder %s1396_s16, %s1396_s16 }
 0x805   :  { %p1801_p0 = scmp.ne.s32.totalorder %s1396_s16, %s1800_s23  ;;  %p1806_p2 = scmp.lt.s32.totalorder %s1800_s23, %s1800_s23 }
 0x807   :  { %p1807_p3 = por %p1806_p2, %p1805_p1 }
 0x809   :  { %p1808_p4 = pnand %p1807_p3, %p1801_p0 }
 0x88f   :  { %v997_v59 = vpop.xlane.xlu1 %996 }
 0x890   :  { %1794 = vrcp.f32 %v997_v59 }
 0x89a   :  { %v1795_v60 = vpop.eup %1794 }
 0x89b   :  { %v999_v61 = vmul.f32 %v1795_v60, %v1793_v51  ;;  %v1781_v51 = vpack.c.bf16 %v1309_v50, %v1308_v49 }
 0x89d   :  { %1593 = vmatmul.mubr.msk.f32.vlgmr.msra.gmra.mrb[18].mxu1 %vm1002_vm13, %v999_v61 }
 0x89e   :  { %1614 = vmatprep.mubr.msk.f32.mxu1 %vm1826_vm2, %v1824_v7  ;;  %1755 = vmatpush3.bf16.msra.mxu1 %v1754_v13 }
 0x89f   :  { %1756 = vmatprep.subr.bf16.mxu1 %v1825_v19 }
 0x8a2   :  { %1758 = vmatpush3.bf16.msra.mxu1 %v1757_v16 }
 0x970   :  { %v1075_v62 = vpop.f32.mrb[18].mxu1 }
 0x971   :  { %v1594_v63 = vpop.f32.mrb[19].mxu1  ;;  %1604 = vmatmul.mubr.msk.f32.vlgmr.msra.gmra.mrb[8].mxu0 %vm737_vm9, %v1075_v62 }
 0x972   :  { %1649 = vmatprep.mubr.msk.f32.mxu0 %vm1826_vm2, %v1824_v7  ;;  %1761 = vmatpush3.bf16.msra.mxu0 %v1760_v20 }
 0x973   :  { %1762 = vmatprep.subr.bf16.mxu0 %v1825_v19 }
 0x976   :  { %1764 = vmatpush3.bf16.msra.mxu0 %v1763_v32 }
 0x977   :  { %1765 = vmatprep.subr.bf16.mxu0 %v1825_v19 }
 0x97a   :  { %1767 = vmatpush3.bf16.msra.mxu0 %v1766_v35 }
 0x97b   :  { %1768 = vmatprep.subr.bf16.mxu0 %v1825_v19 }
 0x97e   :  { %1770 = vmatpush3.bf16.msra.mxu0 %v1769_v38 }
 0x97f   :  { %1771 = vmatprep.subr.bf16.mxu0 %v1825_v19 }
 0x982   :  { %1773 = vmatpush3.bf16.msra.mxu0 %v1772_v41 }
 0x983   :  { %1774 = vmatprep.subr.bf16.mxu0 %v1825_v19 }
 0x986   :  { %1776 = vmatpush3.bf16.msra.mxu0 %v1775_v45 }
 0x987   :  { %1777 = vmatprep.subr.bf16.mxu0 %v1825_v19 }
 0x98a   :  { %1779 = vmatpush3.bf16.msra.mxu0 %v1778_v48 }
 0x98b   :  { %1780 = vmatprep.subr.bf16.mxu0 %v1825_v19  ;;  %v1428_v19 = vld [vmem:[%s2457_s21] ss:$0 sm:$0xff] }
 0x98e   :  { %1782 = vmatpush3.bf16.msra.mxu0 %v1781_v51 }
 0xa44   :  { %v1152_v1 = vpop.f32.mrb[8].mxu0 }
 0xa45   :  { %v1162_v3 = vadd.f32 %v1160_v0, %v1152_v1  ;;  %v1605_v4 = vpop.f32.mrb[9].mxu0 }
 0xa47   :  { %v2335_v5 = vadd.f32 %v1423_v2, %v1162_v3 }
 0xa49   :  { %v1174_v6 = vsel %vm1173_vm14, %v2335_v5, 0.0 }
 0xa4a   :  { %1175 = vadd.xlane.f32.xlu1 %v1174_v6 }
 0xad7   :  { %v1176_v8 = vpop.xlane.xlu1 %1175 }
 0xad8   :  { %v1177_v9 = vmul.f32 0.03125, %v1176_v8 }
 0xada   :  { %v1178_v7 = vsub.f32 %v2335_v5, %v1177_v9 }
 0xadc   :  { %v1179_v10 = vmul.f32 %v1178_v7, %v1178_v7 }
 0xade   :  { %v1180_v42 = vsel %vm1173_vm14, %v1179_v10, 0.0 }
 0xadf   :  { %1181 = vadd.xlane.f32.xlu1 %v1180_v42 }
 0xb6c   :  { %v1182_v21 = vpop.xlane.xlu1 %1181 }
 0xb6d   :  { %v1183_v22 = vmul.f32 0.03125, %v1182_v21 }
 0xb6f   :  { %v1184_v23 = vadd.f32 1e-05, %v1183_v22 }
 0xb71   :  { %1796 = vrsqrt.f32 %v1184_v23 }
 0xb7b   :  { %v1797_v24 = vpop.eup %1796 }
 0xb7c   :  { %v1186_v26 = vmul.f32 %v1797_v24, %v1178_v7 }
 0xb7e   :  { %v1193_v28 = vmul.f32 %v1424_v25, %v1186_v26 }
 0xb80   :  { %v1200_v29 = vadd.f32 %v1425_v27, %v1193_v28 }
 0xb82   :  { %1615 = vmatmul.mubr.msk.f32.vlgmr.msra.gmra.mrb[20].mxu1 %vm737_vm9, %v1200_v29 }
 0xc55   :  { %v1281_v53 = vpop.f32.mrb[20].mxu1 }
 0xc56   :  { %v1282_v54 = vadd.f32 %v1426_v52, %v1281_v53  ;;  %v1616_v55 = vpop.f32.mrb[21].mxu1 }
 0xc58   :  { %v1285_v56 = vmul.f32 %v1282_v54, %v1282_v54 }
 0xc5a   :  { %v1286_v57 = vmul.f32 %v1285_v56, %v1282_v54 }
 0xc5c   :  { %v1287_v58 = vmul.f32 0.044715, %v1286_v57 }
 0xc5e   :  { %v1288_v59 = vadd.f32 %v1287_v58, %v1282_v54 }
 0xc60   :  { %v1289_v60 = vmul.f32 0.7978846, %v1288_v59 }
 0xc62   :  { %1798 = vtanh.f32 %v1289_v60 }
 0xc6c   :  { %v1799_v61 = vpop.eup %1798 }
 0xc6d   :  { %v1291_v62 = vadd.f32 1.0, %v1799_v61 }
 0xc6f   :  { %v1292_v63 = vmul.f32 0.5, %v1291_v62 }
 0xc71   :  { %v1293_v0 = vmul.f32 %v1292_v63, %v1282_v54 }
 0xc73   :  { %1650 = vmatmul.mubr.f32.vlgmr.msra.gmra.mrb[10].mxu0 %v1293_v0 }
 0xd46   :  { %v1383_v1 = vpop.f32.mrb[10].mxu0 }
 0xd47   :  { %v1384_v2 = vadd.f32 %v1428_v19, %v1383_v1  ;;  %v1651_v3 = vpop.f32.mrb[11].mxu0 }
 0xd49   :  { %v1387_v4 = vadd.f32 %v1384_v2, %v2335_v5 }
 0xd4b   :  { %1388 = vst.msk [vmem:[#allocation2] sm:$0x3] %vm1173_vm14, %v1387_v4 }
 0xd4c   :  { %1811 = shalt.err (!%p1808_p4)
}
 0xd4d   :  { %s1812_s21 = scalar_lea.hbm %s2458_s22, 32 }
 0xd4e   :  { %p1813_p5 = scmp.ne.s32.totalorder %s2458_s22, %s1812_s21  ;;  %p1816_p6 = scmp.lt.u32.totalorder %s1812_s21, %s2458_s22 }
 0xd50   :  { %p1818_p7 = pnand %p1816_p6, %p1813_p5 }
 0xd52   :  { %1821 = shalt.err (!%p1818_p7)
}
 0xd53   :  { %1398 = dma.vmem_to_hbm [thread:$0]  %s1396_s16, 32, %s2458_s22, [#allocation3]  }
 0xd54   :  { %1822 = dma.done.wait [#allocation3], 32  }
 0xd55   :  { %1823 = vsyncadd [#allocation3], 4294967264 }
 0xd56   :  { %1402 = vsyncpa [#allocation3], 1 }

</bundles_post_ra>
